<compile_context>
chip_gen: v5e
topology: v5e:2x2
jax: 0.10.0
libtpu: 0.0.40
codegen_flags: <defaults>
</compile_context>

<pallas_src>
import functools

import numpy as np

import jax
import jax.numpy as jnp
from jax.experimental import pallas as pl
from jax.experimental.pallas import tpu as pltpu


def _freqmix_kernel(x_ref, ff_ref, gg_ref, fab_ref, ph_ref, b1_ref, w1_ref, w2_ref,
                    out_ref, *, seq_len, tb, hidden, fp, ffn_chunks):
    eps = 1e-12
    L, TB, H, Fp = seq_len, tb, hidden, fp

    # ---- FilterLayer: one lane-dense DFT round-trip per grid step ------------------
    xt = x_ref[...]                                                    # (L, TB*H) bf16
    z = jnp.dot(ff_ref[...], xt, preferred_element_type=jnp.float32)  # (2Fp, TB*H) f32

    fab = fab_ref[...]                                                 # (4Fp, H) f32
    fa = fab[:2 * Fp]                                                  # [wr; wr]
    fb = fab[2 * Fp:]                                                  # [-wi; wi]
    if TB > 1:                                                         # tile along lanes
        fa = jnp.concatenate([fa] * TB, axis=1)                        # (2Fp, TB*H)
        fb = jnp.concatenate([fb] * TB, axis=1)
    # Complex multiply via a sublane roll (XLU): roll(z, Fp) = [zi; zr].
    ys = z * fa + pltpu.roll(z, shift=Fp, axis=0) * fb                 # (2Fp, TB*H)

    yb = jnp.dot(gg_ref[...], ys.astype(jnp.bfloat16),
                 preferred_element_type=jnp.float32)                   # (L, TB*H)
    h_t = yb + xt.astype(jnp.float32)                                  # residual

    # One-time relayout from the lane-packed filter layout to row-major (TB*L, H).
    if TB > 1:
        h = jnp.concatenate([h_t[:, t * H:(t + 1) * H] for t in range(TB)], axis=0)
    else:
        h = h_t                                                        # (TB*L, H)

    ph = ph_ref[...]                                                   # (8, H) f32
    ln1w, ln1b, b2, ln2w, ln2b = ph[0:1], ph[1:2], ph[2:3], ph[3:4], ph[4:5]

    # LayerNorm 1 (two-pass variance).
    mu = jnp.mean(h, axis=-1, keepdims=True)
    hc = h - mu
    var = jnp.mean(hc * hc, axis=-1, keepdims=True)
    h = hc * jax.lax.rsqrt(var + eps) * ln1w + ln1b                    # (TB*L, H)

    # ---- Feed-forward: bf16 operands, f32 accumulation, chunked over 4H ------------
    h_b = h.astype(jnp.bfloat16)
    b1 = b1_ref[...]                                                   # (1, 4H)
    h4 = b1.shape[1]
    ck = h4 // ffn_chunks
    acc = None
    # TODO(synk): reference FMLP block uses erf-GELU; tanh approximation differs ~1e-3.
    for c in range(ffn_chunks):                                        # static, small
        sl = slice(c * ck, (c + 1) * ck)
        z1 = jnp.dot(h_b, w1_ref[:, sl],
                     preferred_element_type=jnp.float32) + b1[:, sl]   # (TB*L, ck)
        z1 = jax.nn.gelu(z1, approximate=True).astype(jnp.bfloat16)
        p = jnp.dot(z1, w2_ref[sl, :], preferred_element_type=jnp.float32)
        acc = p if acc is None else acc + p                            # (TB*L, H)
    o = acc + b2 + h

    # LayerNorm 2 (two-pass variance).
    mu2 = jnp.mean(o, axis=-1, keepdims=True)
    oc = o - mu2
    var2 = jnp.mean(oc * oc, axis=-1, keepdims=True)
    o = oc * jax.lax.rsqrt(var2 + eps) * ln2w + ln2b

    out_ref[...] = o.astype(out_ref.dtype)


def _dft_matrices_np(L, Fp):
    """Stacked forward/inverse real-DFT matrices, built on host in float64.

    The (n*k) mod L reduction keeps the trig argument exact for any L, fixing the
    f32 angle-precision issue flagged in the review.
    """
    F = L // 2 + 1
    n = np.arange(L, dtype=np.float64)[:, None]
    k = np.arange(F, dtype=np.float64)[None, :]
    ang = 2.0 * np.pi * np.mod(n * k, L) / L                  # (L, F)
    Fr = np.cos(ang).T                                         # (F, L)  real(rfft)
    Fi = -np.sin(ang).T                                        # (F, L)  imag(rfft)
    wk = np.full((F,), 2.0)                                    # irfft bin weights
    wk[0] = 1.0
    if L % 2 == 0:
        wk[F - 1] = 1.0
    Gr = np.cos(ang) * wk[None, :] / L                         # (L, F)
    Gi = -np.sin(ang) * wk[None, :] / L                        # (L, F)
    pad = Fp - F
    FF = np.concatenate([np.pad(Fr, ((0, pad), (0, 0))),
                         np.pad(Fi, ((0, pad), (0, 0)))], axis=0)   # (2Fp, L)
    GG = np.concatenate([np.pad(Gr, ((0, 0), (0, pad))),
                         np.pad(Gi, ((0, 0), (0, pad)))], axis=1)   # (L, 2Fp)
    return FF.astype(np.float32), GG.astype(np.float32)


def _vmem_capacity_bytes():
    try:
        return int(pltpu.get_tpu_info().vmem_capacity_bytes)
    except Exception:
        return 64 * 1024 * 1024          # conservative (v7x per-TC VMEM)


def _ffn_chunks(h4):
    """Chunk the 4H dim so each chunk is <= ~1024 lanes (only when it divides evenly)."""
    n = 1
    while h4 // n > 1024 and h4 % (2 * n) == 0:
        n *= 2
    return n


def _choose_tb(batch, L, H, H4, Fp, vmem_budget):
    """Batch rows per grid step: FFN-M target ~512 rows, VMEM-capped, grid>=2 if possible."""
    # Rough per-batch-row VMEM: double-buffered x (bf16) / out (f32) pipeline buffers
    # plus the dominant f32 intermediates of the filter + FFN stages.
    bytes_per_row = L * H * (2 * 2 + 4 * 2)                  # x/out pipeline buffers
    bytes_per_row += L * H * 4 * 6                           # z/ys/yb/h_t/h/acc values
    bytes_per_row += L * min(H4, 1024) * 4 * 2               # FFN chunk intermediates
    fixed = 2 * 2 * H * H4 * 2                               # W1+W2 bf16, double-buffered
    fixed += (2 * (2 * Fp) * L * 2 + 4 * Fp * H * 4 + 8 * H * 4 + H4 * 4) * 2
    avail = max(vmem_budget - fixed, bytes_per_row)
    tb_cap = max(1, avail // bytes_per_row)
    tb = int(max(1, min(512 // max(L, 1), tb_cap, batch)))
    if tb >= batch:
        # Whole batch in one step only for tiny batches; otherwise keep >= 2 grid steps
        # so both v7x TensorCores get work (dimension_semantics = "parallel").
        tb = batch if batch < 4 else (batch + 1) // 2
    return tb


@jax.jit
def freqmix_rec_layer(input_tensor, attention_mask, params):
    # attention_mask is accepted but unused by the frequency-mixing block (FMLP-Rec).
    del attention_mask
    B, L, H = input_tensor.shape
    H4 = params["w1"].shape[1]
    F = L // 2 + 1
    Fp = ((F + 7) // 8) * 8

    vmem_limit = int(_vmem_capacity_bytes() * 3 // 4)
    TB = _choose_tb(B, L, H, H4, Fp, vmem_limit)
    grid = -(-B // TB)
    B_pad = grid * TB
    n_ck = _ffn_chunks(H4)

    # Host-built DFT matrices: compile-time constants, bf16 MXU operands.
    FF_np, GG_np = _dft_matrices_np(L, Fp)
    FF = jnp.asarray(FF_np, jnp.bfloat16)                               # (2Fp, L)
    GG = jnp.asarray(GG_np, jnp.bfloat16)                               # (L, 2Fp)

    pad = Fp - F
    wr = jnp.pad(params["filt_r"].astype(jnp.float32), ((0, pad), (0, 0)))   # (Fp, H)
    wi = jnp.pad(params["filt_i"].astype(jnp.float32), ((0, pad), (0, 0)))
    fab = jnp.concatenate([wr, wr, -wi, wi], axis=0)                     # (4Fp, H)

    # Consolidated, sublane-aligned small per-row parameters (one DMA instead of five).
    ph = jnp.concatenate(
        [params["ln1_w"], params["ln1_b"], params["b2"],
         params["ln2_w"], params["ln2_b"], jnp.zeros((3, H), jnp.float32)],
        axis=0).astype(jnp.float32)                                      # (8, H)

    w1 = params["w1"].astype(jnp.bfloat16)                               # (H, 4H)
    w2 = params["w2"].astype(jnp.bfloat16)                               # (4H, H)
    b1 = params["b1"].astype(jnp.float32)                                # (1, 4H)

    # bf16 input streaming + lane-packing: (grid, L, TB*H). One XLA transpose per call.
    x = input_tensor.astype(jnp.bfloat16)
    if B_pad != B:
        x = jnp.pad(x, ((0, B_pad - B), (0, 0), (0, 0)))
    x_t = x.reshape(grid, TB, L, H).transpose(0, 2, 1, 3).reshape(grid, L, TB * H)

    # Advisory cost estimate so XLA schedules around the custom call.
    flops = B_pad * (8 * Fp * L * H + 4 * L * H * H4)
    transcendentals = B_pad * L * H4
    bytes_accessed = (B_pad * L * H * (2 + 4)
                      + 2 * (2 * Fp) * L * 2 + 4 * Fp * H * 4 + 8 * H * 4 + H4 * 4
                      + 2 * H * H4 * 2)

    const = lambda shape: pl.BlockSpec(shape, lambda b: (0, 0))

    out3 = pl.pallas_call(
        functools.partial(_freqmix_kernel, seq_len=L, tb=TB, hidden=H, fp=Fp,
                          ffn_chunks=n_ck),
        out_shape=jax.ShapeDtypeStruct((grid, TB * L, H), jnp.float32),
        grid_spec=pltpu.PrefetchScalarGridSpec(
            num_scalar_prefetch=0,
            grid=(grid,),
            in_specs=[
                pl.BlockSpec((None, L, TB * H), lambda b: (b, 0, 0)),  # x slab (bf16)
                const((2 * Fp, L)),     # FF  stacked forward DFT (bf16)
                const((L, 2 * Fp)),     # GG  stacked inverse DFT (bf16)
                const((4 * Fp, H)),     # complex filter [wr; wr; -wi; wi] (f32)
                const((8, H)),          # ln1_w, ln1_b, b2, ln2_w, ln2_b (+ pad rows)
                const((1, H4)),         # b1
                const((H, H4)),         # W1 (bf16)
                const((H4, H)),         # W2 (bf16)
            ],
            out_specs=pl.BlockSpec((None, TB * L, H), lambda b: (b, 0, 0)),
        ),
        compiler_params=pltpu.CompilerParams(
            dimension_semantics=("parallel",),
            vmem_limit_bytes=vmem_limit),
        cost_estimate=pl.CostEstimate(flops=int(flops),
                                      transcendentals=int(transcendentals),
                                      bytes_accessed=int(bytes_accessed)),
    )(x_t, FF, GG, fab, ph, b1, w1, w2)

    # (grid, TB*L, H) -> (B_pad, L, H) is a pure view. Output is written f32 directly:
    # writing bf16 and up-casting in XLA would add a second HBM pass.
    return out3.reshape(B_pad, L, H)[:B]


def init_params(key, L, H):
    """Deterministic synthetic parameters matching the module's shapes."""
    F = L // 2 + 1
    H4 = 4 * H
    ks = jax.random.split(key, 6)
    return {
        # complex_weight ~ randn(1, F, H, 2) * 0.02
        "filt_r": jax.random.normal(ks[0], (F, H), jnp.float32) * 0.02,
        "filt_i": jax.random.normal(ks[1], (F, H), jnp.float32) * 0.02,
        "ln1_w": jnp.ones((1, H), jnp.float32),
        "ln1_b": jnp.zeros((1, H), jnp.float32),
        "w1": jax.random.normal(ks[2], (H, H4), jnp.float32) * 0.02,
        "b1": jax.random.normal(ks[3], (1, H4), jnp.float32) * 0.02,
        "w2": jax.random.normal(ks[4], (H4, H), jnp.float32) * 0.02,
        "b2": jax.random.normal(ks[5], (1, H), jnp.float32) * 0.02,
        "ln2_w": jnp.ones((1, H), jnp.float32),
        "ln2_b": jnp.zeros((1, H), jnp.float32),
    }


if __name__ == "__main__":
    B, L, H = 2, 16, 32
    key = jax.random.PRNGKey(0)
    kx, km, kp = jax.random.split(key, 3)

    input_tensor = jax.random.normal(kx, (B, L, H), jnp.float32)
    # extended attention mask shape as produced by typical rec trainers: (B,1,L,L)
    attention_mask = jnp.zeros((B, 1, L, L), jnp.float32)

    params = init_params(kp, L, H)

    out = freqmix_rec_layer(input_tensor, attention_mask, params)
    out = jax.block_until_ready(out)
    assert out.shape == (B, L, H)
    assert bool(jnp.all(jnp.isfinite(out)))
    print("KERNEL_OK")
</pallas_src>

<mosaic_0001>
module attributes {stable_mosaic.version = 11 : i64} {
  func.func @_freqmix_kernel(%arg0: i32, %arg1: memref<1x16x64xbf16, #tpu.memory_space<vmem>>, %arg2: memref<32x16xbf16, #tpu.memory_space<vmem>>, %arg3: memref<16x32xbf16, #tpu.memory_space<vmem>>, %arg4: memref<64x32xf32, #tpu.memory_space<vmem>>, %arg5: memref<8x32xf32, #tpu.memory_space<vmem>>, %arg6: memref<1x128xf32, #tpu.memory_space<vmem>>, %arg7: memref<32x128xbf16, #tpu.memory_space<vmem>>, %arg8: memref<128x32xbf16, #tpu.memory_space<vmem>>, %arg9: memref<1x32x32xf32, #tpu.memory_space<vmem>>) attributes {dimension_semantics = [#tpu.dimension_semantics<parallel>], iteration_bounds = array<i64: 1>, scalar_prefetch = 0 : i64, scratch_operands = 0 : i64, tpu.core_type = #tpu.core_type<tc>, window_params = [{transform_indices = @transform_0, window_bounds = array<i64: 1, 16, 64>}, {pipeline_mode = #tpu.pipeline_mode<synchronous>, transform_indices = @transform_1, window_bounds = array<i64: 32, 16>}, {pipeline_mode = #tpu.pipeline_mode<synchronous>, transform_indices = @transform_2, window_bounds = array<i64: 16, 32>}, {pipeline_mode = #tpu.pipeline_mode<synchronous>, transform_indices = @transform_3, window_bounds = array<i64: 64, 32>}, {pipeline_mode = #tpu.pipeline_mode<synchronous>, transform_indices = @transform_4, window_bounds = array<i64: 8, 32>}, {pipeline_mode = #tpu.pipeline_mode<synchronous>, transform_indices = @transform_5, window_bounds = array<i64: 1, 128>}, {pipeline_mode = #tpu.pipeline_mode<synchronous>, transform_indices = @transform_6, window_bounds = array<i64: 32, 128>}, {pipeline_mode = #tpu.pipeline_mode<synchronous>, transform_indices = @transform_7, window_bounds = array<i64: 128, 32>}, {transform_indices = @transform_8, window_bounds = array<i64: 1, 32, 32>}]} {
    %c0 = arith.constant 0 : index
    %c0_0 = arith.constant 0 : index
    %c0_1 = arith.constant 0 : index
    %0 = vector.load %arg1[%c0, %c0_0, %c0_1] : memref<1x16x64xbf16, #tpu.memory_space<vmem>>, vector<1x16x64xbf16>
    %1 = vector.shape_cast %0 : vector<1x16x64xbf16> to vector<16x64xbf16>
    %c0_2 = arith.constant 0 : index
    %c0_3 = arith.constant 0 : index
    %2 = vector.load %arg2[%c0_2, %c0_3] : memref<32x16xbf16, #tpu.memory_space<vmem>>, vector<32x16xbf16>
    %cst = arith.constant dense<0.000000e+00> : vector<32x64xf32>
    %3 = tpu.matmul %2, %1, %cst {dimension_numbers = #tpu.dot_dimension_numbers<[1], [0], [0], [1], [0, 0, 1, 1], [], []>} : vector<32x16xbf16>, vector<16x64xbf16>, vector<32x64xf32> -> vector<32x64xf32>
    %c0_4 = arith.constant 0 : index
    %c0_5 = arith.constant 0 : index
    %4 = vector.load %arg4[%c0_4, %c0_5] : memref<64x32xf32, #tpu.memory_space<vmem>>, vector<64x32xf32>
    %5 = vector.extract_strided_slice %4 {offsets = [0, 0], sizes = [32, 32], strides = [1, 1]} : vector<64x32xf32> to vector<32x32xf32>
    %6 = vector.extract_strided_slice %4 {offsets = [32, 0], sizes = [32, 32], strides = [1, 1]} : vector<64x32xf32> to vector<32x32xf32>
    %7 = tpu.concatenate %5, %5 in 1 : vector<32x32xf32>, vector<32x32xf32> -> vector<32x64xf32>
    %8 = tpu.concatenate %6, %6 in 1 : vector<32x32xf32>, vector<32x32xf32> -> vector<32x64xf32>
    %9 = arith.mulf %3, %7 : vector<32x64xf32>
    %c16_i32 = arith.constant 16 : i32
    %10 = tpu.dynamic_rotate %3 by %c16_i32 dim 0 : vector<32x64xf32>, i32 -> vector<32x64xf32>
    %11 = arith.mulf %10, %8 : vector<32x64xf32>
    %12 = arith.addf %9, %11 : vector<32x64xf32>
    %c0_6 = arith.constant 0 : index
    %c0_7 = arith.constant 0 : index
    %13 = vector.load %arg3[%c0_6, %c0_7] : memref<16x32xbf16, #tpu.memory_space<vmem>>, vector<16x32xbf16>
    %14 = arith.truncf %12 : vector<32x64xf32> to vector<32x64xbf16>
    %cst_8 = arith.constant dense<0.000000e+00> : vector<16x64xf32>
    %15 = tpu.matmul %13, %14, %cst_8 {dimension_numbers = #tpu.dot_dimension_numbers<[1], [0], [0], [1], [0, 0, 1, 1], [], []>} : vector<16x32xbf16>, vector<32x64xbf16>, vector<16x64xf32> -> vector<16x64xf32>
    %16 = arith.extf %1 : vector<16x64xbf16> to vector<16x64xf32>
    %17 = arith.addf %15, %16 : vector<16x64xf32>
    %18 = vector.extract_strided_slice %17 {offsets = [0, 0], sizes = [16, 32], strides = [1, 1]} : vector<16x64xf32> to vector<16x32xf32>
    %19 = vector.extract_strided_slice %17 {offsets = [0, 32], sizes = [16, 32], strides = [1, 1]} : vector<16x64xf32> to vector<16x32xf32>
    %20 = tpu.concatenate %18, %19 in 0 : vector<16x32xf32>, vector<16x32xf32> -> vector<32x32xf32>
    %c0_9 = arith.constant 0 : index
    %c0_10 = arith.constant 0 : index
    %21 = vector.load %arg5[%c0_9, %c0_10] : memref<8x32xf32, #tpu.memory_space<vmem>>, vector<8x32xf32>
    %22 = vector.extract_strided_slice %21 {offsets = [0, 0], sizes = [1, 32], strides = [1, 1]} : vector<8x32xf32> to vector<1x32xf32>
    %23 = vector.extract_strided_slice %21 {offsets = [1, 0], sizes = [1, 32], strides = [1, 1]} : vector<8x32xf32> to vector<1x32xf32>
    %24 = vector.extract_strided_slice %21 {offsets = [2, 0], sizes = [1, 32], strides = [1, 1]} : vector<8x32xf32> to vector<1x32xf32>
    %25 = vector.extract_strided_slice %21 {offsets = [3, 0], sizes = [1, 32], strides = [1, 1]} : vector<8x32xf32> to vector<1x32xf32>
    %26 = vector.extract_strided_slice %21 {offsets = [4, 0], sizes = [1, 32], strides = [1, 1]} : vector<8x32xf32> to vector<1x32xf32>
    %cst_11 = arith.constant dense<0.000000e+00> : vector<32xf32>
    %27 = vector.multi_reduction <add>, %20, %cst_11 [1] : vector<32x32xf32> to vector<32xf32>
    %28 = vector.shape_cast %27 : vector<32xf32> to vector<32x1xf32>
    %cst_12 = arith.constant 3.200000e+01 : f32
    %29 = vector.broadcast %cst_12 : f32 to vector<32x1xf32>
    %30 = arith.divf %28, %29 : vector<32x1xf32>
    %31 = vector.broadcast %30 : vector<32x1xf32> to vector<32x32xf32>
    %32 = arith.subf %20, %31 : vector<32x32xf32>
    %33 = arith.mulf %32, %32 : vector<32x32xf32>
    %cst_13 = arith.constant dense<0.000000e+00> : vector<32xf32>
    %34 = vector.multi_reduction <add>, %33, %cst_13 [1] : vector<32x32xf32> to vector<32xf32>
    %35 = vector.shape_cast %34 : vector<32xf32> to vector<32x1xf32>
    %cst_14 = arith.constant 3.200000e+01 : f32
    %36 = vector.broadcast %cst_14 : f32 to vector<32x1xf32>
    %37 = arith.divf %35, %36 : vector<32x1xf32>
    %cst_15 = arith.constant 9.99999996E-13 : f32
    %38 = vector.broadcast %cst_15 : f32 to vector<32x1xf32>
    %39 = arith.addf %37, %38 : vector<32x1xf32>
    %40 = math.rsqrt %39 : vector<32x1xf32>
    %41 = vector.broadcast %40 : vector<32x1xf32> to vector<32x32xf32>
    %42 = arith.mulf %32, %41 : vector<32x32xf32>
    %43 = vector.broadcast %22 : vector<1x32xf32> to vector<32x32xf32>
    %44 = arith.mulf %42, %43 : vector<32x32xf32>
    %45 = vector.broadcast %23 : vector<1x32xf32> to vector<32x32xf32>
    %46 = arith.addf %44, %45 : vector<32x32xf32>
    %47 = arith.truncf %46 : vector<32x32xf32> to vector<32x32xbf16>
    %c0_16 = arith.constant 0 : index
    %c0_17 = arith.constant 0 : index
    %48 = vector.load %arg6[%c0_16, %c0_17] : memref<1x128xf32, #tpu.memory_space<vmem>>, vector<1x128xf32>
    %c0_18 = arith.constant 0 : index
    %c0_19 = arith.constant 0 : index
    %49 = vector.load %arg7[%c0_18, %c0_19] : memref<32x128xbf16, #tpu.memory_space<vmem>>, vector<32x128xbf16>
    %cst_20 = arith.constant dense<0.000000e+00> : vector<32x128xf32>
    %50 = tpu.matmul %47, %49, %cst_20 {dimension_numbers = #tpu.dot_dimension_numbers<[1], [0], [0], [1], [0, 0, 1, 1], [], []>} : vector<32x32xbf16>, vector<32x128xbf16>, vector<32x128xf32> -> vector<32x128xf32>
    %51 = vector.broadcast %48 : vector<1x128xf32> to vector<32x128xf32>
    %52 = arith.addf %50, %51 : vector<32x128xf32>
    %53 = arith.mulf %52, %52 : vector<32x128xf32>
    %54 = arith.mulf %52, %53 : vector<32x128xf32>
    %cst_21 = arith.constant 4.471500e-02 : f32
    %55 = vector.broadcast %cst_21 : f32 to vector<32x128xf32>
    %56 = arith.mulf %55, %54 : vector<32x128xf32>
    %57 = arith.addf %52, %56 : vector<32x128xf32>
    %cst_22 = arith.constant 0.797884583 : f32
    %58 = vector.broadcast %cst_22 : f32 to vector<32x128xf32>
    %59 = arith.mulf %58, %57 : vector<32x128xf32>
    %60 = math.tanh %59 : vector<32x128xf32>
    %cst_23 = arith.constant 1.000000e+00 : f32
    %61 = vector.broadcast %cst_23 : f32 to vector<32x128xf32>
    %62 = arith.addf %61, %60 : vector<32x128xf32>
    %cst_24 = arith.constant 5.000000e-01 : f32
    %63 = vector.broadcast %cst_24 : f32 to vector<32x128xf32>
    %64 = arith.mulf %63, %62 : vector<32x128xf32>
    %65 = arith.mulf %52, %64 : vector<32x128xf32>
    %66 = arith.truncf %65 : vector<32x128xf32> to vector<32x128xbf16>
    %c0_25 = arith.constant 0 : index
    %c0_26 = arith.constant 0 : index
    %67 = vector.load %arg8[%c0_25, %c0_26] : memref<128x32xbf16, #tpu.memory_space<vmem>>, vector<128x32xbf16>
    %cst_27 = arith.constant dense<0.000000e+00> : vector<32x32xf32>
    %68 = tpu.matmul %66, %67, %cst_27 {dimension_numbers = #tpu.dot_dimension_numbers<[1], [0], [0], [1], [0, 0, 1, 1], [], []>} : vector<32x128xbf16>, vector<128x32xbf16>, vector<32x32xf32> -> vector<32x32xf32>
    %69 = vector.broadcast %24 : vector<1x32xf32> to vector<32x32xf32>
    %70 = arith.addf %68, %69 : vector<32x32xf32>
    %71 = arith.addf %70, %46 : vector<32x32xf32>
    %cst_28 = arith.constant dense<0.000000e+00> : vector<32xf32>
    %72 = vector.multi_reduction <add>, %71, %cst_28 [1] : vector<32x32xf32> to vector<32xf32>
    %73 = vector.shape_cast %72 : vector<32xf32> to vector<32x1xf32>
    %cst_29 = arith.constant 3.200000e+01 : f32
    %74 = vector.broadcast %cst_29 : f32 to vector<32x1xf32>
    %75 = arith.divf %73, %74 : vector<32x1xf32>
    %76 = vector.broadcast %75 : vector<32x1xf32> to vector<32x32xf32>
    %77 = arith.subf %71, %76 : vector<32x32xf32>
    %78 = arith.mulf %77, %77 : vector<32x32xf32>
    %cst_30 = arith.constant dense<0.000000e+00> : vector<32xf32>
    %79 = vector.multi_reduction <add>, %78, %cst_30 [1] : vector<32x32xf32> to vector<32xf32>
    %80 = vector.shape_cast %79 : vector<32xf32> to vector<32x1xf32>
    %cst_31 = arith.constant 3.200000e+01 : f32
    %81 = vector.broadcast %cst_31 : f32 to vector<32x1xf32>
    %82 = arith.divf %80, %81 : vector<32x1xf32>
    %cst_32 = arith.constant 9.99999996E-13 : f32
    %83 = vector.broadcast %cst_32 : f32 to vector<32x1xf32>
    %84 = arith.addf %82, %83 : vector<32x1xf32>
    %85 = math.rsqrt %84 : vector<32x1xf32>
    %86 = vector.broadcast %85 : vector<32x1xf32> to vector<32x32xf32>
    %87 = arith.mulf %77, %86 : vector<32x32xf32>
    %88 = vector.broadcast %25 : vector<1x32xf32> to vector<32x32xf32>
    %89 = arith.mulf %87, %88 : vector<32x32xf32>
    %90 = vector.broadcast %26 : vector<1x32xf32> to vector<32x32xf32>
    %91 = arith.addf %89, %90 : vector<32x32xf32>
    %c0_33 = arith.constant 0 : index
    %c0_34 = arith.constant 0 : index
    %c0_35 = arith.constant 0 : index
    %92 = vector.load %arg9[%c0_33, %c0_34, %c0_35] : memref<1x32x32xf32, #tpu.memory_space<vmem>>, vector<1x32x32xf32>
    %93 = vector.shape_cast %92 : vector<1x32x32xf32> to vector<32x32xf32>
    %94 = vector.shape_cast %91 : vector<32x32xf32> to vector<1x32x32xf32>
    tpu.vector_store %arg9[%c0_33, %c0_34, %c0_35], %94 {strides = array<i32>} : memref<1x32x32xf32, #tpu.memory_space<vmem>>, vector<1x32x32xf32>,
    return
  }
  func.func @transform_0(%arg0: i32) -> (i32, i32, i32) {
    %c0_i32 = arith.constant 0 : i32
    %c0_i32_0 = arith.constant 0 : i32
    %c0_i32_1 = arith.constant 0 : i32
    return %arg0, %c0_i32, %c0_i32_0 : i32, i32, i32
  }
  func.func @transform_1(%arg0: i32) -> (i32, i32) {
    %c0_i32 = arith.constant 0 : i32
    %c0_i32_0 = arith.constant 0 : i32
    %c0_i32_1 = arith.constant 0 : i32
    return %c0_i32, %c0_i32_0 : i32, i32
  }
  func.func @transform_2(%arg0: i32) -> (i32, i32) {
    %c0_i32 = arith.constant 0 : i32
    %c0_i32_0 = arith.constant 0 : i32
    %c0_i32_1 = arith.constant 0 : i32
    return %c0_i32, %c0_i32_0 : i32, i32
  }
  func.func @transform_3(%arg0: i32) -> (i32, i32) {
    %c0_i32 = arith.constant 0 : i32
    %c0_i32_0 = arith.constant 0 : i32
    %c0_i32_1 = arith.constant 0 : i32
    return %c0_i32, %c0_i32_0 : i32, i32
  }
  func.func @transform_4(%arg0: i32) -> (i32, i32) {
    %c0_i32 = arith.constant 0 : i32
    %c0_i32_0 = arith.constant 0 : i32
    %c0_i32_1 = arith.constant 0 : i32
    return %c0_i32, %c0_i32_0 : i32, i32
  }
  func.func @transform_5(%arg0: i32) -> (i32, i32) {
    %c0_i32 = arith.constant 0 : i32
    %c0_i32_0 = arith.constant 0 : i32
    %c0_i32_1 = arith.constant 0 : i32
    return %c0_i32, %c0_i32_0 : i32, i32
  }
  func.func @transform_6(%arg0: i32) -> (i32, i32) {
    %c0_i32 = arith.constant 0 : i32
    %c0_i32_0 = arith.constant 0 : i32
    %c0_i32_1 = arith.constant 0 : i32
    return %c0_i32, %c0_i32_0 : i32, i32
  }
  func.func @transform_7(%arg0: i32) -> (i32, i32) {
    %c0_i32 = arith.constant 0 : i32
    %c0_i32_0 = arith.constant 0 : i32
    %c0_i32_1 = arith.constant 0 : i32
    return %c0_i32, %c0_i32_0 : i32, i32
  }
  func.func @transform_8(%arg0: i32) -> (i32, i32, i32) {
    %c0_i32 = arith.constant 0 : i32
    %c0_i32_0 = arith.constant 0 : i32
    %c0_i32_1 = arith.constant 0 : i32
    return %arg0, %c0_i32, %c0_i32_0 : i32, i32, i32
  }
}

</mosaic_0001>

<bundles_post_ra>
// kernel: freqmix_rec_layer.1
= control target key start
LH: loop header
LB: loop body
LE: loop exit
PB: predicated region body
PF: predicated region fallthrough
CT: control target
= control target key end

     0   :  { %s717_s11 = smov 32   ;;  %vm53_vm0 = vcmask 130048   ;;  %s940_s0 = inlined_call_operand.vmem [shape: bf16[1,16,64], index: 0, kind: input, shape index: {}]   ;;  %s941_s1 = inlined_call_operand.vmem [shape: bf16[32,16], index: 1, kind: input, shape index: {}]   ;;  %s942_s2 = inlined_call_operand.vmem [shape: bf16[16,32], index: 2, kind: input, shape index: {}]   ;;  %s943_s3 = inlined_call_operand.vmem [shape: f32[64,32], index: 3, kind: input, shape index: {}]   ;;  %s944_s4 = inlined_call_operand.vmem [shape: f32[8,32], index: 4, kind: input, shape index: {}]   ;;  %s945_s5 = inlined_call_operand.vmem [shape: f32[1,128], index: 5, kind: input, shape index: {}]   ;;  %s946_s6 = inlined_call_operand.vmem [shape: bf16[32,128], index: 6, kind: input, shape index: {}]   ;;  %s947_s7 = inlined_call_operand.vmem [shape: bf16[128,32], index: 7, kind: input, shape index: {}]   ;;  %s948_s8 = inlined_call_operand.hbm [shape: f32[1,32,32], index: 8, kind: output, shape index: {}]  }
   0x1   :  { %v636_v0 = vld [vmem:[%s940_s0] sm:$0xff]  ;;  %v85_v1 = vld [vmem:[%s943_s3 + $0x30] sm:$0xff] }
   0x2   :  { %v637_v2 = vld [vmem:[%s941_s1] sm:$0xff]  ;;  %116 = vrot.lane.b32.xlu1 %v85_v1, %s717_s11  ;;  %v81_v3 = vld [vmem:[%s943_s3 + $0x10] sm:$0xff]  ;;  %67 = vmatpush.bf16.msra.mxu0 %v636_v0 }
   0x3   :  { %95 = vrot.lane.b32.xlu0 %v81_v3, %s717_s11  ;;  %v79_v4 = vld [vmem:[%s943_s3] sm:$0xff] }
   0x4   :  { %91 = vrot.lane.b32.xlu2 %v79_v4, %s717_s11 }
   0x5   :  { %13 = vsyncpa [#allocation3], 0  ;;  %587 = vmatmul.msk.bf16.vlgmr.msra.gmra.mxu0 %vm53_vm0, %v637_v2  ;;  %v86_v5 = vld [vmem:[%s943_s3 + $0x38] sm:$0xff]  ;;  %v80_v7 = vld [vmem:[%s943_s3 + $0x8] sm:$0xff]  ;;  %vm103_vm1 = vcmask 261120   ;;  %s718_s30 = smov 96  }
   0x6   :  { %v82_v6 = vld [vmem:[%s943_s3 + $0x18] sm:$0xff]  ;;  %v84_v8 = vld [vmem:[%s943_s3 + $0x28] sm:$0xff]  ;;  %v83_v9 = vld [vmem:[%s943_s3 + $0x20] sm:$0xff]  ;;  %v719_v55 = vmov 32.0   ;;  %s563_s29 = sshll.u32 %s948_s8, 4  ;;  %s564_s29 = int_to_ptr.hbm [resolvable:$true] %s563_s29 }
   0x7   :  { %v638_v10 = vld [vmem:[%s941_s1 + $0x8] sm:$0xff]  ;;  %v639_v45 = vld [vmem:[%s942_s2] sm:$0xff]  ;;  %665 = vrcp.f32 %v719_v55 }
   0x8   :  { %v31_v46 = vld [vmem:[%s940_s0] sm:$0xff]   ;;  %s722_s0 = smov 8  }
   0x9   :  { %v144_v47 = vunpack.c.l.bf16 %v31_v46  ;;  %v145_v51 = vunpack.c.h.bf16 %v31_v46 }
   0xa   :  { %118 = vrot.lane.b32.xlu1 %v86_v5, %s717_s11 }
   0xb   :  { %97 = vrot.lane.b32.xlu0 %v82_v6, %s717_s11 }
   0xc   :  { %93 = vrot.lane.b32.xlu2 %v80_v7, %s717_s11 }
   0xd   :  { %v666_v58 = vpop.eup %665 }
   0xe   :  { %v190_v59 = vmul.f32 32.0, %v666_v58  ;;  %vm194_vm2 = vweird.f32 %v666_v58 }
  0x10   :  { %v191_v60 = vsub.f32 1.0, %v190_v59 }
  0x12   :  { %114 = vrot.lane.b32.xlu1 %v84_v8, %s717_s11  ;;  %v192_v61 = vmul.f32 %v666_v58, %v191_v60 }
  0x13   :  { %112 = vrot.lane.b32.xlu0 %v83_v9, %s717_s11 }
  0x14   :  { %v193_v62 = vadd.f32 %v666_v58, %v192_v61 }
  0x15   :  { %588 = vmatmul.msk.bf16.gmra.mxu0 %vm53_vm0, %v638_v10 }
  0x16   :  { %v821_v63 = vsel %vm194_vm2, %v666_v58, %v193_v62 }
  0x5e   :  { %v92_v15 = vpop.permute.xlu2 %91 }
  0x5f   :  { %v104_v35 = vsel %vm103_vm1, %v79_v4, %v92_v15 }
  0x66   :  { %v94_v20 = vpop.permute.xlu2 %93 }
  0x67   :  { %v105_v28 = vsel %vm103_vm1, %v80_v7, %v94_v20 }
  0x74   :  { %v117_v12 = vpop.permute.xlu1 %116 }
  0x75   :  { %v96_v13 = vpop.permute.xlu0 %95  ;;  %v126_v22 = vsel %vm103_vm1, %v85_v1, %v117_v12 }
  0x76   :  { %v106_v23 = vsel %vm103_vm1, %v81_v3, %v96_v13 }
  0x7c   :  { %v119_v16 = vpop.permute.xlu1 %118 }
  0x7d   :  { %v98_v17 = vpop.permute.xlu0 %97  ;;  %v127_v24 = vsel %vm103_vm1, %v86_v5, %v119_v16 }
  0x7e   :  { %v107_v27 = vsel %vm103_vm1, %v82_v6, %v98_v17 }
  0x82   :  { %v69_v11 = vpop.f32.mrf.mxu0 }
  0x83   :  { %v134_v31 = vmul.f32 %v126_v22, %v69_v11  ;;  %v128_v40 = vmul.f32 %v104_v35, %v69_v11 }
  0x84   :  { %v115_v19 = vpop.permute.xlu1 %114 }
  0x85   :  { %v113_v21 = vpop.permute.xlu0 %112  ;;  %v125_v25 = vsel %vm103_vm1, %v84_v8, %v115_v19 }
  0x86   :  { %v124_v29 = vsel %vm103_vm1, %v83_v9, %v113_v21 }
  0x8a   :  { %v71_v14 = vpop.f32.mrf.mxu0 }
  0x8b   :  { %v135_v32 = vmul.f32 %v127_v24, %v71_v14  ;;  %v129_v36 = vmul.f32 %v105_v28, %v71_v14 }
  0x92   :  { %v74_v18 = vpop.f32.mrf.mxu0 }
  0x93   :  { %v130_v26 = vmul.f32 %v106_v23, %v74_v18  ;;  %v132_v37 = vmul.f32 %v124_v29, %v74_v18 }
  0x95   :  { %v138_v38 = vadd.f32 %v134_v31, %v130_v26  ;;  %v136_v43 = vadd.f32 %v132_v37, %v128_v40  ;;  %v640_v26 = vld [vmem:[%s946_s6] sm:$0xff] }
  0x9a   :  { %v76_v30 = vpop.f32.mrf.mxu0 }
  0x9b   :  { %v131_v33 = vmul.f32 %v107_v27, %v76_v30  ;;  %v133_v34 = vmul.f32 %v125_v25, %v76_v30  ;;  %v641_v25 = vld [vmem:[%s946_s6 + $0x8] sm:$0xff] }
  0x9c   :  { %316 = vmatpush.bf16.msra.mxu2 %v641_v25  ;;  %v664_v25 = vld [vmem:[%s945_s5] ss:$0 sm:$0xff]  ;;  %s720_s5 = smov [#allocation2]  }
  0x9d   :  { %v139_v39 = vadd.f32 %v135_v32, %v131_v33  ;;  %v137_v42 = vadd.f32 %v133_v34, %v129_v36 }
  0x9f   :  { %v143_v41 = vpack.c.bf16 %v139_v39, %v138_v38  ;;  %v142_v44 = vpack.c.bf16 %v137_v42, %v136_v43 }
  0xa0   :  { %317 = vmatpush.bf16.msra.mxu2 %v640_v26  ;;  %v642_v26 = vld [vmem:[%s947_s7] sm:$0xff] }
  0xa1   :  { %160 = vmatpush.bf16.msrb.mxu0 %v143_v41  ;;  %v851_v41 = vld [vmem:[%s944_s4] sm:$0xff] }
  0xa5   :  { %161 = vmatpush.bf16.msrb.mxu0 %v142_v44  ;;  %v272_v44 = vperm.slane %v851_v41, 0 }
  0xa8   :  { %593 = vmatmul.msk.bf16.vlgmr.msrb.gmra.mxu0 %vm103_vm1, %v639_v45 }
 0x125   :  { %v163_v48 = vpop.f32.mrf.mxu0 }
 0x126   :  { %v164_v49 = vadd.f32 %v163_v48, %v144_v47 }
 0x128   :  { %170 = vrot.lane.b32.xlu2 %v164_v49, %s718_s30  ;;  %v177_v50 = vsel %vm103_vm1, %v164_v49, 0.0 }
 0x129   :  { %178 = vadd.xlane.f32.xlu1 %v177_v50 }
 0x12d   :  { %v165_v52 = vpop.f32.mrf.mxu0 }
 0x12e   :  { %v166_v53 = vadd.f32 %v165_v52, %v145_v51 }
 0x130   :  { %172 = vrot.lane.b32.xlu0 %v166_v53, %s718_s30  ;;  %v180_v54 = vsel %vm103_vm1, %v166_v53, 0.0  ;;  %s721_s30 = smov 128  }
 0x151   :  { %181 = vadd.xlane.f32.xlu2 %v180_v54 }
 0x182   :  { %v171_v56 = vpop.permute.xlu2 %170 }
 0x183   :  { %v183_v57 = vsel %vm103_vm1, %v171_v56, 0.0 }
 0x184   :  { %184 = vadd.xlane.f32.xlu0 %v183_v57 }
 0x19c   :  { %v179_v0 = vpop.xlane.xlu1 %178 }
 0x19d   :  { %v196_v1 = vmul.f32 %v821_v63, %v179_v0 }
 0x19f   :  { %v200_v2 = vsub.f32 %v164_v49, %v196_v1  ;;  %v277_v49 = vperm.slane %v851_v41, 1 }
 0x1a1   :  { %v204_v3 = vmul.f32 %v200_v2, %v200_v2 }
 0x1a2   :  { %v173_v4 = vpop.permute.xlu0 %172 }
 0x1a3   :  { %v186_v5 = vsel %vm103_vm1, %v173_v4, 0.0  ;;  %v208_v6 = vsel %vm103_vm1, %v204_v3, 0.0 }
 0x1a4   :  { %187 = vadd.xlane.f32.xlu2 %v186_v5  ;;  %209 = vadd.xlane.f32.xlu1 %v208_v6 }
 0x1c4   :  { %v182_v7 = vpop.xlane.xlu2 %181 }
 0x1c5   :  { %v197_v8 = vmul.f32 %v821_v63, %v182_v7 }
 0x1c7   :  { %v201_v9 = vsub.f32 %v166_v53, %v197_v8 }
 0x1c9   :  { %v205_v10 = vmul.f32 %v201_v9, %v201_v9 }
 0x1cb   :  { %v211_v11 = vsel %vm103_vm1, %v205_v10, 0.0 }
 0x1cc   :  { %212 = vadd.xlane.f32.xlu2 %v211_v11 }
 0x1f7   :  { %v185_v12 = vpop.xlane.xlu0 %184 }
 0x1f8   :  { %v198_v13 = vmul.f32 %v821_v63, %v185_v12 }
 0x1fa   :  { %v829_v14 = vsub.f32 %v171_v56, %v198_v13 }
 0x1fc   :  { %v206_v15 = vmul.f32 %v829_v14, %v829_v14 }
 0x1fe   :  { %v214_v16 = vsel %vm103_vm1, %v206_v15, 0.0 }
 0x1ff   :  { %215 = vadd.xlane.f32.xlu0 %v214_v16 }
 0x217   :  { %v188_v17 = vpop.xlane.xlu2 %187  ;;  %v210_v22 = vpop.xlane.xlu1 %209 }
 0x218   :  { %v199_v18 = vmul.f32 %v821_v63, %v188_v17  ;;  %v220_v23 = vmul.f32 %v210_v22, %v821_v63  ;;  %v645_v22 = vld [vmem:[%s947_s7 + $0x18] sm:$0xff] }
 0x21a   :  { %v835_v19 = vsub.f32 %v173_v4, %v199_v18  ;;  %v224_v24 = vadd.f32 1e-12, %v220_v23  ;;  %v644_v23 = vld [vmem:[%s947_s7 + $0x10] sm:$0xff] }
 0x21c   :  { %v207_v20 = vmul.f32 %v835_v19, %v835_v19  ;;  %667 = vrsqrt.f32 %v224_v24  ;;  %vm234_vm4 = vweird.f32 %v224_v24 }
 0x21e   :  { %v217_v21 = vsel %vm103_vm1, %v207_v20, 0.0  ;;  %v647_v20 = vld [vmem:[%s947_s7 + $0x28] sm:$0xff] }
 0x21f   :  { %218 = vadd.xlane.f32.xlu1 %v217_v21  ;;  %v646_v21 = vld [vmem:[%s947_s7 + $0x20] sm:$0xff] }
 0x222   :  { %v668_v27 = vpop.eup %667 }
 0x223   :  { %v229_v28 = vmul.f32 %v668_v27, %v224_v24  ;;  %vm235_vm3 = vweird.f32 %v668_v27  ;;  %v643_v24 = vld [vmem:[%s947_s7 + $0x8] sm:$0xff] }
 0x224   :  { %vm236_vm5 = vmor %vm234_vm4, %vm235_vm3 }
 0x225   :  { %v230_v29 = vmul.f32 %v668_v27, %v229_v28 }
 0x227   :  { %v231_v33 = vmul.f32 0.5, %v230_v29 }
 0x229   :  { %v232_v34 = vsub.f32 1.5, %v231_v33 }
 0x22b   :  { %v233_v36 = vmul.f32 %v668_v27, %v232_v34 }
 0x22d   :  { %v237_v39 = vsel %vm236_vm5, %v668_v27, %v233_v36 }
 0x22e   :  { %v268_v43 = vmul.f32 %v237_v39, %v200_v2 }
 0x230   :  { %v273_v48 = vmul.f32 %v272_v44, %v268_v43 }
 0x232   :  { %v855_v51 = vadd.f32 %v277_v49, %v273_v48 }
 0x23f   :  { %v213_v30 = vpop.xlane.xlu2 %212 }
 0x240   :  { %v221_v31 = vmul.f32 %v213_v30, %v821_v63 }
 0x242   :  { %v225_v32 = vadd.f32 1e-12, %v221_v31 }
 0x244   :  { %669 = vrsqrt.f32 %v225_v32  ;;  %vm244_vm7 = vweird.f32 %v225_v32 }
 0x24a   :  { %v670_v35 = vpop.eup %669 }
 0x24b   :  { %v239_v37 = vmul.f32 %v670_v35, %v225_v32  ;;  %vm245_vm6 = vweird.f32 %v670_v35 }
 0x24c   :  { %vm246_vm8 = vmor %vm244_vm7, %vm245_vm6 }
 0x24d   :  { %v240_v38 = vmul.f32 %v670_v35, %v239_v37 }
 0x24f   :  { %v241_v40 = vmul.f32 0.5, %v240_v38 }
 0x251   :  { %v242_v42 = vsub.f32 1.5, %v241_v40 }
 0x253   :  { %v243_v45 = vmul.f32 %v670_v35, %v242_v42 }
 0x255   :  { %v247_v46 = vsel %vm246_vm8, %v670_v35, %v243_v45 }
 0x256   :  { %v269_v47 = vmul.f32 %v247_v46, %v201_v9 }
 0x258   :  { %v274_v50 = vmul.f32 %v272_v44, %v269_v47 }
 0x25a   :  { %v857_v52 = vadd.f32 %v277_v49, %v274_v50 }
 0x25c   :  { %v282_v53 = vpack.c.bf16 %v857_v52, %v855_v51 }
 0x25e   :  { %602 = vmatmul.msk.bf16.vlgmr.msra.gmra.mxu2 %vm103_vm1, %v282_v53 }
 0x272   :  { %v216_v54 = vpop.xlane.xlu0 %215 }
 0x273   :  { %v222_v55 = vmul.f32 %v216_v54, %v821_v63 }
 0x275   :  { %v226_v56 = vadd.f32 1e-12, %v222_v55 }
 0x277   :  { %671 = vrsqrt.f32 %v226_v56  ;;  %vm254_vm10 = vweird.f32 %v226_v56 }
 0x27d   :  { %v672_v57 = vpop.eup %671 }
 0x27e   :  { %v249_v58 = vmul.f32 %v672_v57, %v226_v56  ;;  %vm255_vm9 = vweird.f32 %v672_v57 }
 0x27f   :  { %vm256_vm11 = vmor %vm254_vm10, %vm255_vm9 }
 0x280   :  { %v250_v59 = vmul.f32 %v672_v57, %v249_v58 }
 0x282   :  { %v251_v0 = vmul.f32 0.5, %v250_v59 }
 0x284   :  { %v252_v1 = vsub.f32 1.5, %v251_v0 }
 0x286   :  { %v253_v3 = vmul.f32 %v672_v57, %v252_v1 }
 0x288   :  { %v257_v6 = vsel %vm256_vm11, %v672_v57, %v253_v3 }
 0x289   :  { %v270_v9 = vmul.f32 %v257_v6, %v829_v14  ;;  %v649_v14 = vld [vmem:[%s947_s7 + $0x38] sm:$0xff] }
 0x28a   :  { %432 = vmatpush.bf16.msra.mxu1 %v649_v14  ;;  %650 = vmatpush.bf16.msra.mxu3 %v649_v14 }
 0x28b   :  { %v275_v13 = vmul.f32 %v272_v44, %v270_v9 }
 0x28d   :  { %v866_v16 = vadd.f32 %v277_v49, %v275_v13  ;;  %v383_v13 = vperm.slane %v851_v41, 2 }
 0x292   :  { %v219_v60 = vpop.xlane.xlu1 %218 }
 0x293   :  { %v223_v61 = vmul.f32 %v219_v60, %v821_v63 }
 0x295   :  { %v227_v62 = vadd.f32 1e-12, %v223_v61 }
 0x297   :  { %673 = vrsqrt.f32 %v227_v62  ;;  %vm264_vm13 = vweird.f32 %v227_v62 }
 0x29d   :  { %v674_v2 = vpop.eup %673 }
 0x29e   :  { %v259_v4 = vmul.f32 %v674_v2, %v227_v62  ;;  %vm265_vm12 = vweird.f32 %v674_v2 }
 0x29f   :  { %vm266_vm14 = vmor %vm264_vm13, %vm265_vm12 }
 0x2a0   :  { %v260_v5 = vmul.f32 %v674_v2, %v259_v4 }
 0x2a2   :  { %v261_v7 = vmul.f32 0.5, %v260_v5 }
 0x2a4   :  { %v262_v8 = vsub.f32 1.5, %v261_v7 }
 0x2a6   :  { %v263_v10 = vmul.f32 %v674_v2, %v262_v8 }
 0x2a8   :  { %v267_v11 = vsel %vm266_vm14, %v674_v2, %v263_v10 }
 0x2a9   :  { %v271_v12 = vmul.f32 %v267_v11, %v835_v19  ;;  %v648_v19 = vld [vmem:[%s947_s7 + $0x30] sm:$0xff]  ;;  %s561_s7 = sshll.u32 %s720_s5, 4  ;;  %s562_s7 = int_to_ptr.vmem [resolvable:$true] %s561_s7 }
 0x2aa   :  { %433 = vmatpush.bf16.msra.mxu1 %v648_v19  ;;  %651 = vmatpush.bf16.msra.mxu3 %v648_v19 }
 0x2ab   :  { %v276_v15 = vmul.f32 %v272_v44, %v271_v12 }
 0x2ad   :  { %v868_v17 = vadd.f32 %v277_v49, %v276_v15 }
 0x2ae   :  { %434 = vmatpush.bf16.msra.mxu1 %v647_v20  ;;  %652 = vmatpush.bf16.msra.mxu3 %v647_v20 }
 0x2af   :  { %v283_v18 = vpack.c.bf16 %v868_v17, %v866_v16 }
 0x2b1   :  { %603 = vmatmul.msk.bf16.gmra.mxu2 %vm103_vm1, %v283_v18 }
 0x2b2   :  { %435 = vmatpush.bf16.msra.mxu1 %v646_v21  ;;  %653 = vmatpush.bf16.msra.mxu3 %v646_v21 }
 0x2b6   :  { %436 = vmatpush.bf16.msra.mxu1 %v645_v22  ;;  %654 = vmatpush.bf16.msra.mxu3 %v645_v22 }
 0x2ba   :  { %437 = vmatpush.bf16.msra.mxu1 %v644_v23  ;;  %655 = vmatpush.bf16.msra.mxu3 %v644_v23 }
 0x2be   :  { %438 = vmatpush.bf16.msra.mxu1 %v643_v24  ;;  %656 = vmatpush.bf16.msra.mxu3 %v643_v24 }
 0x2c2   :  { %439 = vmatpush.bf16.msra.mxu1 %v642_v26  ;;  %657 = vmatpush.bf16.msra.mxu3 %v642_v26 }
 0x2e1   :  { %v319_v27 = vpop.f32.mrf.mxu2 }
 0x2e2   :  { %v320_v28 = vadd.f32 %v664_v25, %v319_v27 }
 0x2e4   :  { %v329_v29 = vmul.f32 %v320_v28, %v320_v28 }
 0x2e6   :  { %v333_v30 = vmul.f32 %v329_v29, %v320_v28 }
 0x2e8   :  { %v337_v31 = vmul.f32 0.044715, %v333_v30 }
 0x2e9   :  { %v321_v32 = vpop.f32.mrf.mxu2 }
 0x2ea   :  { %v341_v33 = vadd.f32 %v337_v31, %v320_v28  ;;  %v322_v34 = vadd.f32 %v664_v25, %v321_v32 }
 0x2ec   :  { %v330_v35 = vmul.f32 %v322_v34, %v322_v34  ;;  %v345_v36 = vmul.f32 0.7978846, %v341_v33 }
 0x2ee   :  { %v334_v37 = vmul.f32 %v330_v35, %v322_v34  ;;  %675 = vtanh.f32 %v345_v36 }
 0x2f0   :  { %v338_v38 = vmul.f32 0.044715, %v334_v37 }
 0x2f2   :  { %v342_v39 = vadd.f32 %v338_v38, %v322_v34 }
 0x2f4   :  { %v346_v40 = vmul.f32 0.7978846, %v342_v39  ;;  %v676_v42 = vpop.eup %675 }
 0x2f5   :  { %v353_v43 = vadd.f32 1.0, %v676_v42 }
 0x2f6   :  { %677 = vtanh.f32 %v346_v40 }
 0x2f7   :  { %v357_v46 = vmul.f32 0.5, %v353_v43 }
 0x2f9   :  { %v361_v48 = vmul.f32 %v357_v46, %v320_v28 }
 0x2fc   :  { %v678_v44 = vpop.eup %677 }
 0x2fd   :  { %v354_v45 = vadd.f32 1.0, %v678_v44 }
 0x2ff   :  { %v358_v47 = vmul.f32 0.5, %v354_v45 }
 0x301   :  { %v362_v49 = vmul.f32 %v358_v47, %v322_v34 }
 0x303   :  { %v365_v50 = vpack.c.bf16 %v362_v49, %v361_v48 }
 0x305   :  { %440 = vmatmul.bf16.vlgmr.msra.gmra.mxu1 %v365_v50 }
 0x334   :  { %v324_v53 = vpop.f32.mrf.mxu2 }
 0x335   :  { %v325_v54 = vadd.f32 %v664_v25, %v324_v53 }
 0x337   :  { %v331_v55 = vmul.f32 %v325_v54, %v325_v54 }
 0x339   :  { %v335_v56 = vmul.f32 %v331_v55, %v325_v54 }
 0x33b   :  { %v339_v57 = vmul.f32 0.044715, %v335_v56 }
 0x33c   :  { %v326_v58 = vpop.f32.mrf.mxu2 }
 0x33d   :  { %v343_v59 = vadd.f32 %v339_v57, %v325_v54  ;;  %v327_v60 = vadd.f32 %v664_v25, %v326_v58 }
 0x33f   :  { %v332_v61 = vmul.f32 %v327_v60, %v327_v60  ;;  %v347_v62 = vmul.f32 0.7978846, %v343_v59 }
 0x341   :  { %v336_v0 = vmul.f32 %v332_v61, %v327_v60  ;;  %679 = vtanh.f32 %v347_v62 }
 0x343   :  { %v340_v1 = vmul.f32 0.044715, %v336_v0 }
 0x345   :  { %v344_v2 = vadd.f32 %v340_v1, %v327_v60 }
 0x347   :  { %v348_v3 = vmul.f32 0.7978846, %v344_v2  ;;  %v680_v4 = vpop.eup %679  ;;  %v543_v2 = vperm.slane %v851_v41, 3 }
 0x348   :  { %v355_v5 = vadd.f32 1.0, %v680_v4 }
 0x349   :  { %681 = vtanh.f32 %v348_v3 }
 0x34a   :  { %v359_v8 = vmul.f32 0.5, %v355_v5  ;;  %v548_v5 = vperm.slane %v851_v41, 4 }
 0x34c   :  { %v363_v10 = vmul.f32 %v359_v8, %v325_v54 }
 0x34f   :  { %v682_v6 = vpop.eup %681 }
 0x350   :  { %v356_v7 = vadd.f32 1.0, %v682_v6 }
 0x352   :  { %v360_v9 = vmul.f32 0.5, %v356_v7 }
 0x354   :  { %v364_v11 = vmul.f32 %v360_v9, %v327_v60 }
 0x356   :  { %v366_v12 = vpack.c.bf16 %v364_v11, %v363_v10 }
 0x358   :  { %445 = vmatmul.bf16.vlgmr.msra.gmra.mxu3 %v366_v12 }
 0x382   :  { %v441_v15 = vpop.f32.mrf.mxu1 }
 0x383   :  { %v442_v18 = vadd.f32 %v441_v15, %v383_v13 }
 0x385   :  { %v451_v14 = vadd.f32 %v442_v18, %v855_v51 }
 0x387   :  { %v455_v19 = vsel %vm103_vm1, %v451_v14, 0.0 }
 0x388   :  { %456 = vadd.xlane.f32.xlu2 %v455_v19 }
 0x38a   :  { %v443_v20 = vpop.f32.mrf.mxu1 }
 0x38b   :  { %v444_v21 = vadd.f32 %v443_v20, %v383_v13 }
 0x38d   :  { %v452_v22 = vadd.f32 %v444_v21, %v857_v52 }
 0x38f   :  { %v458_v23 = vsel %vm103_vm1, %v452_v22, 0.0 }
 0x390   :  { %459 = vadd.xlane.f32.xlu0 %v458_v23 }
 0x3db   :  { %v446_v24 = vpop.f32.mrf.mxu3 }
 0x3dc   :  { %v447_v25 = vadd.f32 %v446_v24, %v383_v13 }
 0x3de   :  { %v453_v26 = vadd.f32 %v447_v25, %v866_v16 }
 0x3e0   :  { %v461_v27 = vsel %vm103_vm1, %v453_v26, 0.0 }
 0x3e1   :  { %462 = vadd.xlane.f32.xlu1 %v461_v27 }
 0x3e3   :  { %v448_v28 = vpop.f32.mrf.mxu3 }
 0x3e4   :  { %v449_v29 = vadd.f32 %v448_v28, %v383_v13 }
 0x3e6   :  { %v454_v51 = vadd.f32 %v449_v29, %v868_v17 }
 0x3e8   :  { %v464_v30 = vsel %vm103_vm1, %v454_v51, 0.0 }
 0x3e9   :  { %465 = vadd.xlane.f32.xlu2 %v464_v30 }
 0x3fb   :  { %v457_v31 = vpop.xlane.xlu2 %456 }
 0x3fc   :  { %v467_v52 = vmul.f32 %v457_v31, %v821_v63 }
 0x3fe   :  { %v471_v32 = vsub.f32 %v451_v14, %v467_v52 }
 0x400   :  { %v475_v33 = vmul.f32 %v471_v32, %v471_v32 }
 0x402   :  { %v479_v34 = vsel %vm103_vm1, %v475_v33, 0.0 }
 0x403   :  { %v460_v35 = vpop.xlane.xlu0 %459  ;;  %480 = vadd.xlane.f32.xlu0 %v479_v34 }
 0x404   :  { %v468_v16 = vmul.f32 %v460_v35, %v821_v63 }
 0x406   :  { %v472_v36 = vsub.f32 %v452_v22, %v468_v16 }
 0x408   :  { %v476_v37 = vmul.f32 %v472_v36, %v472_v36 }
 0x40a   :  { %v482_v38 = vsel %vm103_vm1, %v476_v37, 0.0 }
 0x40b   :  { %483 = vadd.xlane.f32.xlu1 %v482_v38 }
 0x454   :  { %v463_v17 = vpop.xlane.xlu1 %462 }
 0x455   :  { %v469_v39 = vmul.f32 %v463_v17, %v821_v63 }
 0x457   :  { %v914_v40 = vsub.f32 %v453_v26, %v469_v39 }
 0x459   :  { %v477_v42 = vmul.f32 %v914_v40, %v914_v40 }
 0x45b   :  { %v485_v43 = vsel %vm103_vm1, %v477_v42, 0.0 }
 0x45c   :  { %v466_v44 = vpop.xlane.xlu2 %465  ;;  %486 = vadd.xlane.f32.xlu2 %v485_v43 }
 0x45d   :  { %v470_v45 = vmul.f32 %v466_v44, %v821_v63 }
 0x45f   :  { %v920_v46 = vsub.f32 %v454_v51, %v470_v45 }
 0x461   :  { %v478_v47 = vmul.f32 %v920_v46, %v920_v46 }
 0x463   :  { %v488_v48 = vsel %vm103_vm1, %v478_v47, 0.0 }
 0x464   :  { %489 = vadd.xlane.f32.xlu0 %v488_v48 }
 0x476   :  { %v481_v49 = vpop.xlane.xlu0 %480 }
 0x477   :  { %v491_v50 = vmul.f32 %v481_v49, %v821_v63 }
 0x479   :  { %v495_v53 = vadd.f32 1e-12, %v491_v50 }
 0x47b   :  { %683 = vrsqrt.f32 %v495_v53  ;;  %vm505_vm0 = vweird.f32 %v495_v53 }
 0x47e   :  { %v484_v54 = vpop.xlane.xlu1 %483 }
 0x47f   :  { %v492_v55 = vmul.f32 %v484_v54, %v821_v63 }
 0x481   :  { %v684_v56 = vpop.eup %683  ;;  %v496_v57 = vadd.f32 1e-12, %v492_v55 }
 0x482   :  { %v500_v58 = vmul.f32 %v684_v56, %v495_v53  ;;  %vm506_vm15 = vweird.f32 %v684_v56 }
 0x483   :  { %685 = vrsqrt.f32 %v496_v57  ;;  %vm507_vm2 = vmor %vm505_vm0, %vm506_vm15  ;;  %vm515_vm4 = vweird.f32 %v496_v57 }
 0x484   :  { %v501_v59 = vmul.f32 %v684_v56, %v500_v58 }
 0x486   :  { %v502_v60 = vmul.f32 0.5, %v501_v59 }
 0x488   :  { %v503_v61 = vsub.f32 1.5, %v502_v60 }
 0x489   :  { %v686_v62 = vpop.eup %685 }
 0x48a   :  { %v504_v0 = vmul.f32 %v684_v56, %v503_v61  ;;  %v510_v1 = vmul.f32 %v686_v62, %v496_v57  ;;  %vm516_vm3 = vweird.f32 %v686_v62 }
 0x48b   :  { %vm517_vm5 = vmor %vm515_vm4, %vm516_vm3 }
 0x48c   :  { %v508_v3 = vsel %vm507_vm2, %v684_v56, %v504_v0  ;;  %v511_v4 = vmul.f32 %v686_v62, %v510_v1 }
 0x48d   :  { %v539_v6 = vmul.f32 %v508_v3, %v471_v32 }
 0x48e   :  { %v512_v7 = vmul.f32 0.5, %v511_v4 }
 0x48f   :  { %v544_v8 = vmul.f32 %v543_v2, %v539_v6 }
 0x490   :  { %v513_v9 = vsub.f32 1.5, %v512_v7 }
 0x491   :  { %v549_v10 = vadd.f32 %v548_v5, %v544_v8 }
 0x492   :  { %v514_v11 = vmul.f32 %v686_v62, %v513_v9 }
 0x493   :  { %553 = vst.msk [vmem:[#allocation2] sm:$0xff] %vm103_vm1, %v549_v10 }
 0x494   :  { %v518_v12 = vsel %vm517_vm5, %v686_v62, %v514_v11 }
 0x495   :  { %v540_v13 = vmul.f32 %v518_v12, %v472_v36 }
 0x497   :  { %v545_v15 = vmul.f32 %v543_v2, %v540_v13 }
 0x499   :  { %v550_v18 = vadd.f32 %v548_v5, %v545_v15 }
 0x49b   :  { %554 = vst.msk [vmem:[#allocation2 + $0x8] sm:$0xff] %vm103_vm1, %v550_v18 }
 0x4cf   :  { %v487_v14 = vpop.xlane.xlu2 %486 }
 0x4d0   :  { %v493_v41 = vmul.f32 %v487_v14, %v821_v63 }
 0x4d2   :  { %v497_v19 = vadd.f32 1e-12, %v493_v41 }
 0x4d4   :  { %687 = vrsqrt.f32 %v497_v19  ;;  %vm525_vm7 = vweird.f32 %v497_v19 }
 0x4d7   :  { %v490_v20 = vpop.xlane.xlu0 %489 }
 0x4d8   :  { %v494_v21 = vmul.f32 %v490_v20, %v821_v63 }
 0x4da   :  { %v688_v22 = vpop.eup %687  ;;  %v498_v23 = vadd.f32 1e-12, %v494_v21 }
 0x4db   :  { %v520_v24 = vmul.f32 %v688_v22, %v497_v19  ;;  %vm526_vm6 = vweird.f32 %v688_v22 }
 0x4dc   :  { %689 = vrsqrt.f32 %v498_v23  ;;  %vm527_vm8 = vmor %vm525_vm7, %vm526_vm6  ;;  %vm535_vm10 = vweird.f32 %v498_v23 }
 0x4dd   :  { %v521_v25 = vmul.f32 %v688_v22, %v520_v24 }
 0x4df   :  { %v522_v26 = vmul.f32 0.5, %v521_v25 }
 0x4e1   :  { %v523_v27 = vsub.f32 1.5, %v522_v26 }
 0x4e2   :  { %v690_v28 = vpop.eup %689 }
 0x4e3   :  { %v524_v29 = vmul.f32 %v688_v22, %v523_v27  ;;  %v530_v51 = vmul.f32 %v690_v28, %v498_v23  ;;  %vm536_vm9 = vweird.f32 %v690_v28 }
 0x4e4   :  { %vm537_vm11 = vmor %vm535_vm10, %vm536_vm9 }
 0x4e5   :  { %v528_v30 = vsel %vm527_vm8, %v688_v22, %v524_v29  ;;  %v531_v31 = vmul.f32 %v690_v28, %v530_v51 }
 0x4e6   :  { %v541_v52 = vmul.f32 %v528_v30, %v914_v40 }
 0x4e7   :  { %v532_v32 = vmul.f32 0.5, %v531_v31 }
 0x4e8   :  { %v546_v33 = vmul.f32 %v543_v2, %v541_v52 }
 0x4e9   :  { %v533_v63 = vsub.f32 1.5, %v532_v32 }
 0x4ea   :  { %v551_v34 = vadd.f32 %v548_v5, %v546_v33 }
 0x4eb   :  { %v534_v35 = vmul.f32 %v690_v28, %v533_v63 }
 0x4ec   :  { %555 = vst.msk [vmem:[#allocation2 + $0x10] sm:$0xff] %vm103_vm1, %v551_v34 }
 0x4ed   :  { %v538_v16 = vsel %vm537_vm11, %v690_v28, %v534_v35 }
 0x4ee   :  { %v542_v36 = vmul.f32 %v538_v16, %v920_v46 }
 0x4f0   :  { %v547_v37 = vmul.f32 %v543_v2, %v542_v36 }
 0x4f2   :  { %v552_v38 = vadd.f32 %v548_v5, %v547_v37 }
 0x4f4   :  { %556 = vst.msk [vmem:[#allocation2 + $0x18] sm:$0xff] %vm103_vm1, %v552_v38 }
 0x4f5   :  { %569 = dma.vmem_to_hbm [thread:$0]  %s562_s7, 512, %s564_s29, [#allocation3], %s721_s30, %s721_s30, %s722_s0  }
 0x4f6   :  { %715 = dma.done.wait [#allocation3], 512  }
 0x4f7   :  { %716 = vsyncadd [#allocation3], 4294966784 }
 0x4f8   :  { %574 = vsyncpa [#allocation3], 1 }

</bundles_post_ra>
